<compile_context>
chip_gen: v7x
topology: tpu7x:2x2x1
jax: 0.10.0
libtpu: 0.0.40
codegen_flags: <defaults>
</compile_context>

<pallas_src>
import jax
import jax.numpy as jnp
from jax import lax
from jax.experimental import pallas as pl
from jax.experimental.pallas import tpu as pltpu

LANE = 128
VMEM_BUDGET = 40 * 1024 * 1024  # conservative: fits v7x's 64 MiB physical VMEM


def _round_up(x, m):
    return (x + m - 1) // m * m


def nn_attack_kernel(x_ref, w1_ref, b1_ref, w2t_ref, b2t_ref, o_ref):
    """One batch tile: out_t[o, b] = sum_k W2_t[o, k] * relu(x @ W1 + b1)[b, k] + b2[o].

    The batch axis of the output is the lane axis (tb is a multiple of 128), so the
    store is lane-dense and only out_dim_padded (8/16) rows ever reach HBM.
    Accumulation is f32 via preferred_element_type; bias + ReLU run in f32 on the VPU.
    """
    x = x_ref[...]
    h = jnp.dot(x, w1_ref[...], preferred_element_type=jnp.float32)
    h = jnp.maximum(h + b1_ref[...], 0.0)                      # f32 bias + ReLU
    out_t = lax.dot_general(                                   # (out_pad, tb), NT matmul
        w2t_ref[...], h.astype(w2t_ref.dtype),
        dimension_numbers=(((1,), (1,)), ((), ())),
        preferred_element_type=jnp.float32)
    o_ref[...] = (out_t + b2t_ref[...]).astype(o_ref.dtype)


def nn_attack_forward(x, w1, b1, w2, b2, *, block_batch=8192):
    """NNAttack forward (input_dim -> hidden -> output_dim) via pallas_call.

    x: (B, input_dim); w1: (input_dim, hidden); b1: (1, hidden) or (hidden,);
    w2: (hidden, output_dim); b2: (1, output_dim) or (output_dim,).
    Returns (B, output_dim) in x.dtype.
    """
    out_dtype = x.dtype
    B, in_dim = x.shape
    hidden, out_dim = w2.shape
    assert w1.shape == (in_dim, hidden)

    # ---- host-side zero padding to MXU/lane-friendly shapes (numerically inert) ----
    hp = _round_up(hidden, LANE)                      # hidden -> lane multiple
    w_itemsize = jnp.dtype(w2.dtype).itemsize
    sublane_min = max(8, 32 // w_itemsize)            # 8 f32, 16 bf16, 32 int8/fp8
    op = _round_up(out_dim, sublane_min)              # output rows -> sublane multiple
    b1 = jnp.reshape(b1, (1, hidden))
    b2 = jnp.reshape(b2, (out_dim,))
    w1p = jnp.pad(w1, ((0, 0), (0, hp - hidden)))
    b1p = jnp.pad(b1, ((0, 0), (0, hp - hidden))).astype(jnp.float32)
    # second layer, pre-transposed to (out_pad, hidden_pad): zero rows/cols contribute 0
    w2t = jnp.pad(jnp.transpose(w2), ((0, op - out_dim), (0, hp - hidden)))
    b2t = jnp.pad(b2, (0, op - out_dim)).reshape(op, 1).astype(jnp.float32)

    # ---- batch tiling: lane-multiple tiles, >=2 grid steps when B allows (megacore) ----
    x_itemsize = jnp.dtype(x.dtype).itemsize
    out_itemsize = jnp.dtype(out_dtype).itemsize
    tb = _round_up(min(block_batch, max(LANE, _round_up(-(-B // 2), LANE))), LANE)

    def vmem_estimate(tb_):
        x_tiles = 2 * tb_ * in_dim * x_itemsize       # double-buffered x tile
        o_tiles = 2 * op * tb_ * out_itemsize         # double-buffered out tile
        weights = (in_dim * hp + op * hp) * w_itemsize + (hp + op) * 4
        scratch = tb_ * hp * 4                        # f32 hidden activations
        return x_tiles + o_tiles + weights + scratch

    while tb > LANE and vmem_estimate(tb) > VMEM_BUDGET:
        tb = max(LANE, _round_up(tb // 2, LANE))

    bp = _round_up(B, tb)
    xp = x if bp == B else jnp.pad(x, ((0, bp - B), (0, 0)))
    grid = (bp // tb,)

    vmem_limit = None
    if vmem_estimate(tb) > (14 << 20):                # would overflow v5e's 16 MiB default
        vmem_limit = int(min(max(2 * vmem_estimate(tb), 32 << 20), 48 << 20))

    def resident(shape):
        # Weights/biases: same block every grid step -> stay resident in VMEM.
        return pl.BlockSpec(shape, lambda i: (0, 0))

    out_t_padded = pl.pallas_call(
        nn_attack_kernel,
        out_shape=jax.ShapeDtypeStruct((op, bp), out_dtype),
        grid_spec=pltpu.PrefetchScalarGridSpec(
            num_scalar_prefetch=0,
            grid=grid,
            in_specs=[
                pl.BlockSpec((tb, in_dim), lambda i: (i, 0)),   # x batch tile
                resident(w1p.shape),
                resident(b1p.shape),
                resident(w2t.shape),
                resident(b2t.shape),
            ],
            out_specs=pl.BlockSpec((op, tb), lambda i: (0, i)),  # batch on lanes
        ),
        compiler_params=pltpu.CompilerParams(
            dimension_semantics=("parallel",),        # shard batch tiles across v7x's 2 TCs
            vmem_limit_bytes=vmem_limit,
        ),
    )(xp, w1p, b1p, w2t, b2t)

    # strip sublane/batch padding and un-transpose: (op, bp) -> (B, out_dim)
    return out_t_padded[:out_dim, :B].T


def init_params(key, input_dim, hidden, output_dim, dtype=jnp.float32):
    """Deterministic synthetic init mirroring nn.Linear shapes (kept in the
    transposed (in, out) layout used by the kernel).
    # TODO(synk): not bit-identical to PyTorch's Kaiming-uniform nn.Linear init.
    """
    k1, k2, k3, k4 = jax.random.split(key, 4)
    w1 = jax.random.normal(k1, (input_dim, hidden), dtype) * (1.0 / jnp.sqrt(input_dim))
    b1 = jax.random.normal(k2, (1, hidden), dtype) * 0.01
    w2 = jax.random.normal(k3, (hidden, output_dim), dtype) * (1.0 / jnp.sqrt(hidden))
    b2 = jax.random.normal(k4, (1, output_dim), dtype) * 0.01
    return w1, b1, w2, b2


def reference_forward(x, w1, b1, w2, b2):
    h = jnp.maximum(x @ w1 + jnp.reshape(b1, (1, -1)), 0.0)
    return h @ w2 + jnp.reshape(b2, (1, -1))


if __name__ == "__main__":
    # Shapes consistent with NNAttack(input_dim=32, output_dim=1, hiddens=[100])
    batch, input_dim, hidden, output_dim = 8, 32, 100, 1

    key = jax.random.PRNGKey(0)
    kx, kp = jax.random.split(key)
    x = jax.random.normal(kx, (batch, input_dim), jnp.float32)
    w1, b1, w2, b2 = init_params(kp, input_dim, hidden, output_dim)

    # f32 path (strict check vs pure-JAX reference)
    out = jax.block_until_ready(nn_attack_forward(x, w1, b1, w2, b2))
    ref = reference_forward(x, w1, b1, w2, b2)
    assert out.shape == (batch, output_dim)
    assert jnp.allclose(out, ref, atol=1e-5, rtol=1e-5), "mismatch vs JAX reference (f32)"

    # bf16 path: x / weights already produced in bf16 upstream (no host casts inside
    # the wrapper); f32 accumulation + f32 bias/ReLU, looser tolerance.
    xb = x.astype(jnp.bfloat16)
    w1b, w2b = w1.astype(jnp.bfloat16), w2.astype(jnp.bfloat16)
    out_bf16 = jax.block_until_ready(nn_attack_forward(xb, w1b, b1, w2b, b2))
    assert out_bf16.shape == (batch, output_dim)
    assert jnp.allclose(out_bf16.astype(jnp.float32), ref, atol=1e-1, rtol=1e-1), \
        "mismatch vs JAX reference (bf16)"

    print("KERNEL_OK")
</pallas_src>

<mosaic_0001>
module attributes {stable_mosaic.version = 11 : i64} {
  func.func @nn_attack_kernel(%arg0: i32, %arg1: memref<128x32xf32, #tpu.memory_space<vmem>>, %arg2: memref<32x128xf32, #tpu.memory_space<vmem>>, %arg3: memref<1x128xf32, #tpu.memory_space<vmem>>, %arg4: memref<8x128xf32, #tpu.memory_space<vmem>>, %arg5: memref<8x1xf32, #tpu.memory_space<vmem>>, %arg6: memref<8x128xf32, #tpu.memory_space<vmem>>) attributes {dimension_semantics = [#tpu.dimension_semantics<parallel>], iteration_bounds = array<i64: 1>, scalar_prefetch = 0 : i64, scratch_operands = 0 : i64, tpu.core_type = #tpu.core_type<tc>, window_params = [{transform_indices = @transform_0, window_bounds = array<i64: 128, 32>}, {pipeline_mode = #tpu.pipeline_mode<synchronous>, transform_indices = @transform_1, window_bounds = array<i64: 32, 128>}, {pipeline_mode = #tpu.pipeline_mode<synchronous>, transform_indices = @transform_2, window_bounds = array<i64: 1, 128>}, {pipeline_mode = #tpu.pipeline_mode<synchronous>, transform_indices = @transform_3, window_bounds = array<i64: 8, 128>}, {pipeline_mode = #tpu.pipeline_mode<synchronous>, transform_indices = @transform_4, window_bounds = array<i64: 8, 1>}, {transform_indices = @transform_5, window_bounds = array<i64: 8, 128>}]} {
    %c0 = arith.constant 0 : index
    %c0_0 = arith.constant 0 : index
    %0 = vector.load %arg1[%c0, %c0_0] : memref<128x32xf32, #tpu.memory_space<vmem>>, vector<128x32xf32>
    %c0_1 = arith.constant 0 : index
    %c0_2 = arith.constant 0 : index
    %1 = vector.load %arg2[%c0_1, %c0_2] : memref<32x128xf32, #tpu.memory_space<vmem>>, vector<32x128xf32>
    %cst = arith.constant dense<0.000000e+00> : vector<128x128xf32>
    %2 = tpu.matmul %0, %1, %cst {dimension_numbers = #tpu.dot_dimension_numbers<[1], [0], [0], [1], [0, 0, 1, 1], [], []>} : vector<128x32xf32>, vector<32x128xf32>, vector<128x128xf32> -> vector<128x128xf32>
    %c0_3 = arith.constant 0 : index
    %c0_4 = arith.constant 0 : index
    %3 = vector.load %arg3[%c0_3, %c0_4] : memref<1x128xf32, #tpu.memory_space<vmem>>, vector<1x128xf32>
    %4 = vector.broadcast %3 : vector<1x128xf32> to vector<128x128xf32>
    %5 = arith.addf %2, %4 : vector<128x128xf32>
    %cst_5 = arith.constant 0.000000e+00 : f32
    %6 = vector.broadcast %cst_5 : f32 to vector<128x128xf32>
    %7 = arith.maximumf %5, %6 : vector<128x128xf32>
    %c0_6 = arith.constant 0 : index
    %c0_7 = arith.constant 0 : index
    %8 = vector.load %arg4[%c0_6, %c0_7] : memref<8x128xf32, #tpu.memory_space<vmem>>, vector<8x128xf32>
    %cst_8 = arith.constant dense<0.000000e+00> : vector<8x128xf32>
    %9 = tpu.matmul %8, %7, %cst_8 {dimension_numbers = #tpu.dot_dimension_numbers<[1], [1], [0], [0], [0, 0, 1, 0], [], []>} : vector<8x128xf32>, vector<128x128xf32>, vector<8x128xf32> -> vector<8x128xf32>
    %c0_9 = arith.constant 0 : index
    %c0_10 = arith.constant 0 : index
    %10 = vector.load %arg5[%c0_9, %c0_10] : memref<8x1xf32, #tpu.memory_space<vmem>>, vector<8x1xf32>
    %11 = vector.broadcast %10 : vector<8x1xf32> to vector<8x128xf32>
    %12 = arith.addf %9, %11 : vector<8x128xf32>
    %c0_11 = arith.constant 0 : index
    %c0_12 = arith.constant 0 : index
    %13 = vector.load %arg6[%c0_11, %c0_12] : memref<8x128xf32, #tpu.memory_space<vmem>>, vector<8x128xf32>
    tpu.vector_store %arg6[%c0_11, %c0_12], %12 {strides = array<i32>} : memref<8x128xf32, #tpu.memory_space<vmem>>, vector<8x128xf32>,
    return
  }
  func.func @transform_0(%arg0: i32) -> (i32, i32) {
    %c0_i32 = arith.constant 0 : i32
    %c0_i32_0 = arith.constant 0 : i32
    return %arg0, %c0_i32 : i32, i32
  }
  func.func @transform_1(%arg0: i32) -> (i32, i32) {
    %c0_i32 = arith.constant 0 : i32
    %c0_i32_0 = arith.constant 0 : i32
    %c0_i32_1 = arith.constant 0 : i32
    return %c0_i32, %c0_i32_0 : i32, i32
  }
  func.func @transform_2(%arg0: i32) -> (i32, i32) {
    %c0_i32 = arith.constant 0 : i32
    %c0_i32_0 = arith.constant 0 : i32
    %c0_i32_1 = arith.constant 0 : i32
    return %c0_i32, %c0_i32_0 : i32, i32
  }
  func.func @transform_3(%arg0: i32) -> (i32, i32) {
    %c0_i32 = arith.constant 0 : i32
    %c0_i32_0 = arith.constant 0 : i32
    %c0_i32_1 = arith.constant 0 : i32
    return %c0_i32, %c0_i32_0 : i32, i32
  }
  func.func @transform_4(%arg0: i32) -> (i32, i32) {
    %c0_i32 = arith.constant 0 : i32
    %c0_i32_0 = arith.constant 0 : i32
    %c0_i32_1 = arith.constant 0 : i32
    return %c0_i32, %c0_i32_0 : i32, i32
  }
  func.func @transform_5(%arg0: i32) -> (i32, i32) {
    %c0_i32 = arith.constant 0 : i32
    %c0_i32_0 = arith.constant 0 : i32
    return %c0_i32, %arg0 : i32, i32
  }
}

</mosaic_0001>

<bundles_post_ra>
// kernel: tpu_custom_call.1
= control target key start
LH: loop header
LB: loop body
LE: loop exit
PB: predicated region body
PF: predicated region fallthrough
CT: control target
= control target key end

     0   :  { %vm48_vm0 = vcmask 261120   ;;  %s673_s0 = inlined_call_operand.vmem [shape: f32[128,32], index: 0, kind: input, shape index: {}]   ;;  %s674_s1 = inlined_call_operand.vmem [shape: f32[32,128], index: 1, kind: input, shape index: {}]   ;;  %s675_s2 = inlined_call_operand.vmem [shape: f32[1,128], index: 2, kind: input, shape index: {}]   ;;  %s676_s3 = inlined_call_operand.vmem [shape: f32[8,128], index: 3, kind: input, shape index: {}]   ;;  %s677_s4 = inlined_call_operand.vmem [shape: f32[8,1], index: 4, kind: input, shape index: {}]   ;;  %s678_s5 = inlined_call_operand.hbm [shape: f32[8,128], index: 5, kind: output, shape index: {}]  }
   0x1   :  { %v37_v0 = vld [vmem:[%s674_s1] sm:$0xff]  ;;  %v38_v1 = vld [vmem:[%s674_s1 + $0x8] sm:$0xff]  ;;  %v39_v2 = vld [vmem:[%s674_s1 + $0x10] sm:$0xff] }
   0x2   :  { %v471_v3 = vpack.c.bf16 %v38_v1, %v37_v0  ;;  %v40_v4 = vld [vmem:[%s674_s1 + $0x18] sm:$0xff]  ;;  %v21_v5 = vld [vmem:[%s673_s0] sm:$0xff] }
   0x3   :  { %v475_v6 = vpack.c.bf16 %v40_v4, %v39_v2  ;;  %412 = vmatprep.mubr.msk.f32.mxu0 %vm48_vm0, %v21_v5 }
   0x4   :  { %472 = vmatprep.subr.bf16.mxu0 %v471_v3 }
   0x5   :  { %474 = vmatpush3.bf16.msra.mxu0 %v471_v3 }
   0x6   :  { %476 = vmatprep.subr.bf16.mxu0 %v475_v6 }
   0x7   :  { %10 = vsyncpa [#allocation3], 0  ;;  %v22_v7 = vld [vmem:[%s673_s0 + $0x8] sm:$0xff]  ;;  %v23_v8 = vld [vmem:[%s673_s0 + $0x10] sm:$0xff]  ;;  %v533_v22 = vmov 0.0|0.0   ;;  %vm534_vm1 = vmmov 0  }
   0x8   :  { %v24_v9 = vld [vmem:[%s673_s0 + $0x18] sm:$0xff]  ;;  %v25_v10 = vld [vmem:[%s673_s0 + $0x20] sm:$0xff]  ;;  %v26_v11 = vld [vmem:[%s673_s0 + $0x28] sm:$0xff]  ;;  %479 = vmatprep.subr.bf16.mxu1 %v533_v22  ;;  %v535_v23 = vmov 0.0   ;;  %v536_v25 = vmov 0  }
   0x9   :  { %478 = vmatpush3.bf16.msra.mxu0 %v475_v6  ;;  %v27_v12 = vld [vmem:[%s673_s0 + $0x30] sm:$0xff]  ;;  %v28_v13 = vld [vmem:[%s673_s0 + $0x38] sm:$0xff]  ;;  %v29_v14 = vld [vmem:[%s673_s0 + $0x40] sm:$0xff]  ;;  %468 = vmatprep.mubr.msk.f32.mxu1 %vm534_vm1, %v535_v23 }
   0xa   :  { %v30_v15 = vld [vmem:[%s673_s0 + $0x48] sm:$0xff]  ;;  %v31_v16 = vld [vmem:[%s673_s0 + $0x50] sm:$0xff]  ;;  %v32_v17 = vld [vmem:[%s673_s0 + $0x58] sm:$0xff]  ;;  %508 = vset.pattern.permute.xlu0 %v536_v25 }
   0xb   :  { %v33_v18 = vld [vmem:[%s673_s0 + $0x60] sm:$0xff]  ;;  %v34_v19 = vld [vmem:[%s673_s0 + $0x68] sm:$0xff]  ;;  %v35_v20 = vld [vmem:[%s673_s0 + $0x70] sm:$0xff] }
   0xc   :  { %413 = vmatmul.mubr.msk.f32.vlgmr.msra.gmra.mrb[0].mxu0 %vm48_vm0, %v22_v7  ;;  %v36_v21 = vld [vmem:[%s673_s0 + $0x78] sm:$0xff]  ;;  %v259_v24 = vld [vmem:[%s677_s4] sm:$0xff]  ;;  %s537_s4 = smov [#allocation2]  }
   0xd   :  { %415 = vmatprep.mubr.msk.f32.mxu0 %vm48_vm0, %v23_v8  ;;  %262 = vperm.xlu0 %508, %v259_v24   ;;  %v350_v26 = vld [vmem:[%s675_s2] ss:$0 sm:$0xff]  ;;  %s342_s10 = sshll.u32 %s537_s4, 4  ;;  %s343_s10 = int_to_ptr.vmem [resolvable:$true] %s342_s10 }
   0xe   :  { %s509_s11 = scalar_lea.vmem %s343_s10, 128  ;;  %p514_p1 = scmp.lt.s32.totalorder %s343_s10, %s343_s10 }
   0xf   :  { %p510_p0 = scmp.ne.s32.totalorder %s343_s10, %s509_s11  ;;  %p515_p2 = scmp.lt.s32.totalorder %s509_s11, %s509_s11 }
  0x10   :  { %416 = vmatmul.mubr.msk.f32.gmra.mrb[2].mxu0 %vm48_vm0, %v24_v9 }
  0x11   :  { %418 = vmatprep.mubr.msk.f32.mxu0 %vm48_vm0, %v25_v10  ;;  %p516_p3 = por %p515_p2, %p514_p1 }
  0x13   :  { %p517_p4 = pnand %p516_p3, %p510_p0 }
  0x14   :  { %419 = vmatmul.mubr.msk.f32.gmra.mrb[4].mxu0 %vm48_vm0, %v26_v11 }
  0x15   :  { %421 = vmatprep.mubr.msk.f32.mxu0 %vm48_vm0, %v27_v12 }
  0x18   :  { %422 = vmatmul.mubr.msk.f32.gmra.mrb[6].mxu0 %vm48_vm0, %v28_v13 }
  0x19   :  { %424 = vmatprep.mubr.msk.f32.mxu0 %vm48_vm0, %v29_v14 }
  0x1c   :  { %425 = vmatmul.mubr.msk.f32.gmra.mrb[8].mxu0 %vm48_vm0, %v30_v15 }
  0x1d   :  { %427 = vmatprep.mubr.msk.f32.mxu0 %vm48_vm0, %v31_v16 }
  0x20   :  { %428 = vmatmul.mubr.msk.f32.gmra.mrb[10].mxu0 %vm48_vm0, %v32_v17 }
  0x21   :  { %430 = vmatprep.mubr.msk.f32.mxu0 %vm48_vm0, %v33_v18 }
  0x24   :  { %431 = vmatmul.mubr.msk.f32.gmra.mrb[12].mxu0 %vm48_vm0, %v34_v19  ;;  %v258_v19 = vld [vmem:[%s676_s3] sm:$0xff] }
  0x25   :  { %433 = vmatprep.mubr.msk.f32.mxu0 %vm48_vm0, %v35_v20 }
  0x28   :  { %434 = vmatmul.mubr.msk.f32.gmra.mrb[14].mxu0 %vm48_vm0, %v36_v21 }
  0x8c   :  { %v263_v20 = vpop.permute.xlu0 %262 }
  0xdf   :  { %v414_v27 = vpop.f32.mrb[0].mxu0 }
  0xe0   :  { %v169_v28 = vadd.f32 %v414_v27, %v350_v26  ;;  %v163_v29 = vpop.f32.mrb[1].mxu0 }
  0xe1   :  { %v164_v30 = vadd.f32 %v350_v26, %v163_v29 }
  0xe2   :  { %v243_v31 = vmax.f32 %v169_v28, 0.0 }
  0xe3   :  { %v242_v32 = vmax.f32 %v164_v30, 0.0  ;;  %v417_v33 = vpop.f32.mrb[2].mxu0 }
  0xe4   :  { %v179_v34 = vadd.f32 %v417_v33, %v350_v26  ;;  %v173_v35 = vpop.f32.mrb[3].mxu0 }
  0xe5   :  { %v174_v36 = vadd.f32 %v350_v26, %v173_v35  ;;  %v480_v37 = vpack.c.bf16 %v243_v31, %v242_v32 }
  0xe6   :  { %v245_v38 = vmax.f32 %v179_v34, 0.0 }
  0xe7   :  { %v244_v39 = vmax.f32 %v174_v36, 0.0  ;;  %481 = vmatpush3.bf16.xpose.msra.mxu1 %v480_v37  ;;  %v420_v40 = vpop.f32.mrb[4].mxu0 }
  0xe8   :  { %v189_v41 = vadd.f32 %v420_v40, %v350_v26  ;;  %482 = vmatprep.subr.bf16.mxu1 %v533_v22  ;;  %v183_v42 = vpop.f32.mrb[5].mxu0 }
  0xe9   :  { %v483_v43 = vpack.c.bf16 %v245_v38, %v244_v39  ;;  %v184_v44 = vadd.f32 %v350_v26, %v183_v42 }
  0xea   :  { %v247_v45 = vmax.f32 %v189_v41, 0.0 }
  0xeb   :  { %v246_v46 = vmax.f32 %v184_v44, 0.0  ;;  %v423_v47 = vpop.f32.mrb[6].mxu0 }
  0xec   :  { %v199_v48 = vadd.f32 %v423_v47, %v350_v26  ;;  %v193_v49 = vpop.f32.mrb[7].mxu0 }
  0xed   :  { %v486_v50 = vpack.c.bf16 %v247_v45, %v246_v46  ;;  %v194_v51 = vadd.f32 %v350_v26, %v193_v49 }
  0xee   :  { %v249_v52 = vmax.f32 %v199_v48, 0.0 }
  0xef   :  { %484 = vmatpush3.bf16.xpose.msra.mxu1 %v483_v43  ;;  %v248_v53 = vmax.f32 %v194_v51, 0.0  ;;  %v426_v54 = vpop.f32.mrb[8].mxu0 }
  0xf0   :  { %485 = vmatprep.subr.bf16.mxu1 %v533_v22  ;;  %v209_v55 = vadd.f32 %v426_v54, %v350_v26  ;;  %v203_v56 = vpop.f32.mrb[9].mxu0 }
  0xf1   :  { %v489_v57 = vpack.c.bf16 %v249_v52, %v248_v53  ;;  %v204_v58 = vadd.f32 %v350_v26, %v203_v56 }
  0xf2   :  { %v251_v59 = vmax.f32 %v209_v55, 0.0 }
  0xf3   :  { %v250_v60 = vmax.f32 %v204_v58, 0.0  ;;  %v429_v61 = vpop.f32.mrb[10].mxu0 }
  0xf4   :  { %v219_v62 = vadd.f32 %v429_v61, %v350_v26  ;;  %v213_v63 = vpop.f32.mrb[11].mxu0 }
  0xf5   :  { %v492_v0 = vpack.c.bf16 %v251_v59, %v250_v60  ;;  %v214_v1 = vadd.f32 %v350_v26, %v213_v63 }
  0xf6   :  { %v253_v2 = vmax.f32 %v219_v62, 0.0 }
  0xf7   :  { %487 = vmatpush3.bf16.xpose.msra.mxu1 %v486_v50  ;;  %v252_v3 = vmax.f32 %v214_v1, 0.0  ;;  %v432_v4 = vpop.f32.mrb[12].mxu0 }
  0xf8   :  { %488 = vmatprep.subr.bf16.mxu1 %v533_v22  ;;  %v229_v5 = vadd.f32 %v432_v4, %v350_v26  ;;  %v223_v6 = vpop.f32.mrb[13].mxu0 }
  0xf9   :  { %v495_v7 = vpack.c.bf16 %v253_v2, %v252_v3  ;;  %v224_v8 = vadd.f32 %v350_v26, %v223_v6 }
  0xfa   :  { %v255_v9 = vmax.f32 %v229_v5, 0.0 }
  0xfb   :  { %v254_v10 = vmax.f32 %v224_v8, 0.0  ;;  %v435_v11 = vpop.f32.mrb[14].mxu0 }
  0xfc   :  { %v239_v12 = vadd.f32 %v435_v11, %v350_v26  ;;  %v233_v13 = vpop.f32.mrb[15].mxu0 }
  0xfd   :  { %v498_v14 = vpack.c.bf16 %v255_v9, %v254_v10  ;;  %v234_v15 = vadd.f32 %v350_v26, %v233_v13 }
  0xfe   :  { %v257_v16 = vmax.f32 %v239_v12, 0.0 }
  0xff   :  { %490 = vmatpush3.bf16.xpose.msra.mxu1 %v489_v57  ;;  %v256_v17 = vmax.f32 %v234_v15, 0.0 }
 0x100   :  { %491 = vmatprep.subr.bf16.mxu1 %v533_v22 }
 0x101   :  { %v501_v18 = vpack.c.bf16 %v257_v16, %v256_v17 }
 0x107   :  { %493 = vmatpush3.bf16.xpose.msra.mxu1 %v492_v0 }
 0x108   :  { %494 = vmatprep.subr.bf16.mxu1 %v533_v22 }
 0x10f   :  { %496 = vmatpush3.bf16.xpose.msra.mxu1 %v495_v7 }
 0x110   :  { %497 = vmatprep.subr.bf16.mxu1 %v533_v22 }
 0x117   :  { %499 = vmatpush3.bf16.xpose.msra.mxu1 %v498_v14 }
 0x118   :  { %500 = vmatprep.subr.bf16.mxu1 %v533_v22 }
 0x11f   :  { %502 = vmatpush3.bf16.xpose.msra.mxu1 %v501_v18 }
 0x126   :  { %469 = vmatmul.mubr.f32.vlgmr.msra.gmra.mrb[0].mxu1 %v258_v19 }
 0x1f9   :  { %v331_v21 = vpop.f32.mrb[0].mxu1 }
 0x1fa   :  { %v332_v23 = vadd.f32 %v331_v21, %v263_v20  ;;  %v470_v24 = vpop.f32.mrb[1].mxu1 }
 0x1fc   :  { %335 = vst [vmem:[#allocation2] sm:$0xff] %v332_v23 }
 0x1fd   :  { %520 = shalt.err (!%p517_p4)
}
 0x1fe   :  { %s521_s3 = scalar_lea.hbm %s678_s5, 128 }
 0x1ff   :  { %p522_p5 = scmp.ne.s32.totalorder %s678_s5, %s521_s3  ;;  %p525_p6 = scmp.lt.u32.totalorder %s521_s3, %s678_s5 }
 0x201   :  { %p527_p7 = pnand %p525_p6, %p522_p5 }
 0x203   :  { %530 = shalt.err (!%p527_p7)
}
 0x204   :  { %345 = dma.vmem_to_hbm [thread:$0]  %s343_s10, 128, %s678_s5, [#allocation3]  }
 0x205   :  { %531 = dma.done.wait [#allocation3], 128  }
 0x206   :  { %532 = vsyncadd [#allocation3], 4294967168 }
 0x207   :  { %349 = vsyncpa [#allocation3], 1 }

</bundles_post_ra>
